<compile_context>
chip_gen: v7x
topology: tpu7x:2x2x1
jax: 0.10.0
libtpu: 0.0.40
codegen_flags: <defaults>
</compile_context>

<pallas_src>
import jax
import jax.numpy as jnp
from jax.experimental import pallas as pl
from jax.experimental.pallas import tpu as pltpu


def _make_hbm_copy_kernel(chunk_starts, chunk_sizes):
    """Kernel that copies src -> dst entirely via chunked HBM->HBM DMAs.

    `chunk_starts` / `chunk_sizes` are static row offsets/extents along the
    leading dimension; each chunk gets its own DMA + semaphore so the DMA
    engines can overlap the transfers.
    """
    n = len(chunk_starts)

    def kernel(src_ref, dst_ref, sems):
        copies = []
        for i in range(n):
            start = chunk_starts[i]
            size = chunk_sizes[i]
            cp = pltpu.make_async_copy(
                src_ref.at[pl.ds(start, size)],
                dst_ref.at[pl.ds(start, size)],
                sems.at[i],
            )
            cp.start()
            copies.append(cp)
        for cp in copies:
            cp.wait()

    return kernel


def _pallas_param_copy(t, *, max_chunks=8):
    """Materialized copy of `t` via direct HBM->HBM DMAs (no VMEM round-trip)."""
    if t.size == 0:
        # Nothing to copy; degenerate grid/DMA would be invalid.
        return t

    orig_shape = t.shape
    # Keep the original layout for ndim >= 1 (no wrapper reshape -> no hidden
    # XLA copies).  Scalars get a trivial (1, 1) view for slicing purposes.
    t_work = t.reshape(1, 1) if t.ndim == 0 else t

    rows = t_work.shape[0]
    num_chunks = max(1, min(max_chunks, rows))
    chunk_rows = pl.cdiv(rows, num_chunks)

    chunk_starts = []
    chunk_sizes = []
    start = 0
    while start < rows:
        size = min(chunk_rows, rows - start)
        chunk_starts.append(start)
        chunk_sizes.append(size)
        start += size
    n = len(chunk_starts)

    kernel = _make_hbm_copy_kernel(tuple(chunk_starts), tuple(chunk_sizes))

    out = pl.pallas_call(
        kernel,
        out_shape=jax.ShapeDtypeStruct(t_work.shape, t_work.dtype),
        in_specs=[pl.BlockSpec(memory_space=pl.ANY)],
        out_specs=pl.BlockSpec(memory_space=pl.ANY),
        scratch_shapes=[pltpu.SemaphoreType.DMA((n,))],
    )(t_work)

    return out.reshape(orig_shape)


def tensor_module_forward(t, *args, materialize_copy=False, **kwargs):
    """Pallas/JAX equivalent of TensorModule.forward.

    Extra *args / **kwargs are accepted and ignored, mirroring the PyTorch
    module.  Default path: return the parameter `t` as-is (zero HBM traffic —
    the forward pass is a pure read-out, so no copy kernel is needed).
    `materialize_copy=True` returns a fresh buffer produced by chunked
    HBM->HBM DMAs inside a Pallas kernel.
    """
    if not materialize_copy:
        return t
    return _pallas_param_copy(t)


if __name__ == "__main__":
    key = jax.random.PRNGKey(0)
    k0, k1, k2 = jax.random.split(key, 3)

    # Deterministic "parameter" tensor wrapped by the module (small, aligned).
    t = jax.random.normal(k0, (32, 128), dtype=jnp.float32)
    # Dummy inputs — forward ignores them, just like the PyTorch module.
    dummy_x = jnp.zeros((2, 4), dtype=jnp.float32)

    # 1) Default (zero-copy) forward path.
    out_fast = tensor_module_forward(t, dummy_x, some_kwarg=123)
    out_fast = jax.block_until_ready(out_fast)
    assert out_fast.shape == t.shape and out_fast.dtype == t.dtype
    assert bool(jnp.all(out_fast == t))

    # 2) Materialized copy — chunked HBM->HBM DMA path.
    out_copy = tensor_module_forward(t, dummy_x, materialize_copy=True)
    out_copy = jax.block_until_ready(out_copy)
    assert out_copy.shape == t.shape and out_copy.dtype == t.dtype
    assert bool(jnp.all(out_copy == t))

    # 3) Odd, non-lane-aligned shape with non-divisible chunking (3-D, bf16).
    t_odd = jax.random.normal(k1, (5, 7, 33), dtype=jnp.float32).astype(jnp.bfloat16)
    out_odd = _pallas_param_copy(t_odd, max_chunks=4)
    out_odd = jax.block_until_ready(out_odd)
    assert out_odd.shape == t_odd.shape and out_odd.dtype == t_odd.dtype
    assert bool(jnp.all(out_odd == t_odd))

    # 4) 1-D tensor (single whole-array DMA) and scalar tensor.
    t_vec = jax.random.normal(k2, (100,), dtype=jnp.float32)
    out_vec = jax.block_until_ready(_pallas_param_copy(t_vec))
    assert bool(jnp.all(out_vec == t_vec))
    t_scalar = jnp.float32(3.5)
    out_scalar = jax.block_until_ready(_pallas_param_copy(t_scalar))
    assert out_scalar.shape == () and bool(out_scalar == t_scalar)

    # 5) Zero-size tensor early return.
    t_empty = jnp.zeros((0, 8), dtype=jnp.float32)
    out_empty = tensor_module_forward(t_empty, materialize_copy=True)
    assert out_empty.shape == t_empty.shape

    print("KERNEL_OK")
</pallas_src>

<mosaic_0001>
module attributes {stable_mosaic.version = 11 : i64} {
  func.func @kernel(%arg0: memref<32x128xf32, #tpu.memory_space<any>>, %arg1: memref<32x128xf32, #tpu.memory_space<any>>, %arg2: memref<8x!tpu.dma_semaphore, #tpu.memory_space<semaphore_mem>>) attributes {dimension_semantics = [], scalar_prefetch = 0 : i64, scratch_operands = 1 : i64, tpu.core_type = #tpu.core_type<tc>} {
    %c0_i32 = arith.constant 0 : i32
    %c0_i32_0 = arith.constant 0 : i32
    %c0_i32_1 = arith.constant 0 : i32
    %0 = tpu.memref_slice %arg0[%c0_i32_0, %c0_i32_1] : memref<32x128xf32, #tpu.memory_space<any>> -> memref<4x128xf32, #tpu.memory_space<any>>
    %c0_i32_2 = arith.constant 0 : i32
    %c0_i32_3 = arith.constant 0 : i32
    %1 = tpu.memref_slice %arg1[%c0_i32_2, %c0_i32_3] : memref<32x128xf32, #tpu.memory_space<any>> -> memref<4x128xf32, #tpu.memory_space<any>>
    %2 = tpu.memref_slice %arg2[%c0_i32] : memref<8x!tpu.dma_semaphore, #tpu.memory_space<semaphore_mem>> -> memref<1x!tpu.dma_semaphore, #tpu.memory_space<semaphore_mem>>
    %3 = tpu.memref_squeeze %2 : memref<1x!tpu.dma_semaphore, #tpu.memory_space<semaphore_mem>> -> memref<!tpu.dma_semaphore, #tpu.memory_space<semaphore_mem>>
    tpu.enqueue_dma source(%0 : memref<4x128xf32, #tpu.memory_space<any>>) target(%1 : memref<4x128xf32, #tpu.memory_space<any>>) target_semaphore(%3 : memref<!tpu.dma_semaphore, #tpu.memory_space<semaphore_mem>>)
    %c1_i32 = arith.constant 1 : i32
    %c4_i32 = arith.constant 4 : i32
    %c0_i32_4 = arith.constant 0 : i32
    %4 = tpu.memref_slice %arg0[%c4_i32, %c0_i32_4] : memref<32x128xf32, #tpu.memory_space<any>> -> memref<4x128xf32, #tpu.memory_space<any>>
    %c4_i32_5 = arith.constant 4 : i32
    %c0_i32_6 = arith.constant 0 : i32
    %5 = tpu.memref_slice %arg1[%c4_i32_5, %c0_i32_6] : memref<32x128xf32, #tpu.memory_space<any>> -> memref<4x128xf32, #tpu.memory_space<any>>
    %6 = tpu.memref_slice %arg2[%c1_i32] : memref<8x!tpu.dma_semaphore, #tpu.memory_space<semaphore_mem>> -> memref<1x!tpu.dma_semaphore, #tpu.memory_space<semaphore_mem>>
    %7 = tpu.memref_squeeze %6 : memref<1x!tpu.dma_semaphore, #tpu.memory_space<semaphore_mem>> -> memref<!tpu.dma_semaphore, #tpu.memory_space<semaphore_mem>>
    tpu.enqueue_dma source(%4 : memref<4x128xf32, #tpu.memory_space<any>>) target(%5 : memref<4x128xf32, #tpu.memory_space<any>>) target_semaphore(%7 : memref<!tpu.dma_semaphore, #tpu.memory_space<semaphore_mem>>)
    %c2_i32 = arith.constant 2 : i32
    %c8_i32 = arith.constant 8 : i32
    %c0_i32_7 = arith.constant 0 : i32
    %8 = tpu.memref_slice %arg0[%c8_i32, %c0_i32_7] : memref<32x128xf32, #tpu.memory_space<any>> -> memref<4x128xf32, #tpu.memory_space<any>>
    %c8_i32_8 = arith.constant 8 : i32
    %c0_i32_9 = arith.constant 0 : i32
    %9 = tpu.memref_slice %arg1[%c8_i32_8, %c0_i32_9] : memref<32x128xf32, #tpu.memory_space<any>> -> memref<4x128xf32, #tpu.memory_space<any>>
    %10 = tpu.memref_slice %arg2[%c2_i32] : memref<8x!tpu.dma_semaphore, #tpu.memory_space<semaphore_mem>> -> memref<1x!tpu.dma_semaphore, #tpu.memory_space<semaphore_mem>>
    %11 = tpu.memref_squeeze %10 : memref<1x!tpu.dma_semaphore, #tpu.memory_space<semaphore_mem>> -> memref<!tpu.dma_semaphore, #tpu.memory_space<semaphore_mem>>
    tpu.enqueue_dma source(%8 : memref<4x128xf32, #tpu.memory_space<any>>) target(%9 : memref<4x128xf32, #tpu.memory_space<any>>) target_semaphore(%11 : memref<!tpu.dma_semaphore, #tpu.memory_space<semaphore_mem>>)
    %c3_i32 = arith.constant 3 : i32
    %c12_i32 = arith.constant 12 : i32
    %c0_i32_10 = arith.constant 0 : i32
    %12 = tpu.memref_slice %arg0[%c12_i32, %c0_i32_10] : memref<32x128xf32, #tpu.memory_space<any>> -> memref<4x128xf32, #tpu.memory_space<any>>
    %c12_i32_11 = arith.constant 12 : i32
    %c0_i32_12 = arith.constant 0 : i32
    %13 = tpu.memref_slice %arg1[%c12_i32_11, %c0_i32_12] : memref<32x128xf32, #tpu.memory_space<any>> -> memref<4x128xf32, #tpu.memory_space<any>>
    %14 = tpu.memref_slice %arg2[%c3_i32] : memref<8x!tpu.dma_semaphore, #tpu.memory_space<semaphore_mem>> -> memref<1x!tpu.dma_semaphore, #tpu.memory_space<semaphore_mem>>
    %15 = tpu.memref_squeeze %14 : memref<1x!tpu.dma_semaphore, #tpu.memory_space<semaphore_mem>> -> memref<!tpu.dma_semaphore, #tpu.memory_space<semaphore_mem>>
    tpu.enqueue_dma source(%12 : memref<4x128xf32, #tpu.memory_space<any>>) target(%13 : memref<4x128xf32, #tpu.memory_space<any>>) target_semaphore(%15 : memref<!tpu.dma_semaphore, #tpu.memory_space<semaphore_mem>>)
    %c4_i32_13 = arith.constant 4 : i32
    %c16_i32 = arith.constant 16 : i32
    %c0_i32_14 = arith.constant 0 : i32
    %16 = tpu.memref_slice %arg0[%c16_i32, %c0_i32_14] : memref<32x128xf32, #tpu.memory_space<any>> -> memref<4x128xf32, #tpu.memory_space<any>>
    %c16_i32_15 = arith.constant 16 : i32
    %c0_i32_16 = arith.constant 0 : i32
    %17 = tpu.memref_slice %arg1[%c16_i32_15, %c0_i32_16] : memref<32x128xf32, #tpu.memory_space<any>> -> memref<4x128xf32, #tpu.memory_space<any>>
    %18 = tpu.memref_slice %arg2[%c4_i32_13] : memref<8x!tpu.dma_semaphore, #tpu.memory_space<semaphore_mem>> -> memref<1x!tpu.dma_semaphore, #tpu.memory_space<semaphore_mem>>
    %19 = tpu.memref_squeeze %18 : memref<1x!tpu.dma_semaphore, #tpu.memory_space<semaphore_mem>> -> memref<!tpu.dma_semaphore, #tpu.memory_space<semaphore_mem>>
    tpu.enqueue_dma source(%16 : memref<4x128xf32, #tpu.memory_space<any>>) target(%17 : memref<4x128xf32, #tpu.memory_space<any>>) target_semaphore(%19 : memref<!tpu.dma_semaphore, #tpu.memory_space<semaphore_mem>>)
    %c5_i32 = arith.constant 5 : i32
    %c20_i32 = arith.constant 20 : i32
    %c0_i32_17 = arith.constant 0 : i32
    %20 = tpu.memref_slice %arg0[%c20_i32, %c0_i32_17] : memref<32x128xf32, #tpu.memory_space<any>> -> memref<4x128xf32, #tpu.memory_space<any>>
    %c20_i32_18 = arith.constant 20 : i32
    %c0_i32_19 = arith.constant 0 : i32
    %21 = tpu.memref_slice %arg1[%c20_i32_18, %c0_i32_19] : memref<32x128xf32, #tpu.memory_space<any>> -> memref<4x128xf32, #tpu.memory_space<any>>
    %22 = tpu.memref_slice %arg2[%c5_i32] : memref<8x!tpu.dma_semaphore, #tpu.memory_space<semaphore_mem>> -> memref<1x!tpu.dma_semaphore, #tpu.memory_space<semaphore_mem>>
    %23 = tpu.memref_squeeze %22 : memref<1x!tpu.dma_semaphore, #tpu.memory_space<semaphore_mem>> -> memref<!tpu.dma_semaphore, #tpu.memory_space<semaphore_mem>>
    tpu.enqueue_dma source(%20 : memref<4x128xf32, #tpu.memory_space<any>>) target(%21 : memref<4x128xf32, #tpu.memory_space<any>>) target_semaphore(%23 : memref<!tpu.dma_semaphore, #tpu.memory_space<semaphore_mem>>)
    %c6_i32 = arith.constant 6 : i32
    %c24_i32 = arith.constant 24 : i32
    %c0_i32_20 = arith.constant 0 : i32
    %24 = tpu.memref_slice %arg0[%c24_i32, %c0_i32_20] : memref<32x128xf32, #tpu.memory_space<any>> -> memref<4x128xf32, #tpu.memory_space<any>>
    %c24_i32_21 = arith.constant 24 : i32
    %c0_i32_22 = arith.constant 0 : i32
    %25 = tpu.memref_slice %arg1[%c24_i32_21, %c0_i32_22] : memref<32x128xf32, #tpu.memory_space<any>> -> memref<4x128xf32, #tpu.memory_space<any>>
    %26 = tpu.memref_slice %arg2[%c6_i32] : memref<8x!tpu.dma_semaphore, #tpu.memory_space<semaphore_mem>> -> memref<1x!tpu.dma_semaphore, #tpu.memory_space<semaphore_mem>>
    %27 = tpu.memref_squeeze %26 : memref<1x!tpu.dma_semaphore, #tpu.memory_space<semaphore_mem>> -> memref<!tpu.dma_semaphore, #tpu.memory_space<semaphore_mem>>
    tpu.enqueue_dma source(%24 : memref<4x128xf32, #tpu.memory_space<any>>) target(%25 : memref<4x128xf32, #tpu.memory_space<any>>) target_semaphore(%27 : memref<!tpu.dma_semaphore, #tpu.memory_space<semaphore_mem>>)
    %c7_i32 = arith.constant 7 : i32
    %c28_i32 = arith.constant 28 : i32
    %c0_i32_23 = arith.constant 0 : i32
    %28 = tpu.memref_slice %arg0[%c28_i32, %c0_i32_23] : memref<32x128xf32, #tpu.memory_space<any>> -> memref<4x128xf32, #tpu.memory_space<any>>
    %c28_i32_24 = arith.constant 28 : i32
    %c0_i32_25 = arith.constant 0 : i32
    %29 = tpu.memref_slice %arg1[%c28_i32_24, %c0_i32_25] : memref<32x128xf32, #tpu.memory_space<any>> -> memref<4x128xf32, #tpu.memory_space<any>>
    %30 = tpu.memref_slice %arg2[%c7_i32] : memref<8x!tpu.dma_semaphore, #tpu.memory_space<semaphore_mem>> -> memref<1x!tpu.dma_semaphore, #tpu.memory_space<semaphore_mem>>
    %31 = tpu.memref_squeeze %30 : memref<1x!tpu.dma_semaphore, #tpu.memory_space<semaphore_mem>> -> memref<!tpu.dma_semaphore, #tpu.memory_space<semaphore_mem>>
    tpu.enqueue_dma source(%28 : memref<4x128xf32, #tpu.memory_space<any>>) target(%29 : memref<4x128xf32, #tpu.memory_space<any>>) target_semaphore(%31 : memref<!tpu.dma_semaphore, #tpu.memory_space<semaphore_mem>>)
    %c0_i32_26 = arith.constant 0 : i32
    %c0_i32_27 = arith.constant 0 : i32
    %c0_i32_28 = arith.constant 0 : i32
    %32 = tpu.memref_slice %arg0[%c0_i32_27, %c0_i32_28] : memref<32x128xf32, #tpu.memory_space<any>> -> memref<4x128xf32, #tpu.memory_space<any>>
    %c0_i32_29 = arith.constant 0 : i32
    %c0_i32_30 = arith.constant 0 : i32
    %33 = tpu.memref_slice %arg1[%c0_i32_29, %c0_i32_30] : memref<32x128xf32, #tpu.memory_space<any>> -> memref<4x128xf32, #tpu.memory_space<any>>
    %34 = tpu.memref_slice %arg2[%c0_i32_26] : memref<8x!tpu.dma_semaphore, #tpu.memory_space<semaphore_mem>> -> memref<1x!tpu.dma_semaphore, #tpu.memory_space<semaphore_mem>>
    %35 = tpu.memref_squeeze %34 : memref<1x!tpu.dma_semaphore, #tpu.memory_space<semaphore_mem>> -> memref<!tpu.dma_semaphore, #tpu.memory_space<semaphore_mem>>
    tpu.wait_dma2 semaphore(%35 : memref<!tpu.dma_semaphore, #tpu.memory_space<semaphore_mem>>) src(%32 : memref<4x128xf32, #tpu.memory_space<any>>) dst(%33 : memref<4x128xf32, #tpu.memory_space<any>>)
    %c1_i32_31 = arith.constant 1 : i32
    %c4_i32_32 = arith.constant 4 : i32
    %c0_i32_33 = arith.constant 0 : i32
    %36 = tpu.memref_slice %arg0[%c4_i32_32, %c0_i32_33] : memref<32x128xf32, #tpu.memory_space<any>> -> memref<4x128xf32, #tpu.memory_space<any>>
    %c4_i32_34 = arith.constant 4 : i32
    %c0_i32_35 = arith.constant 0 : i32
    %37 = tpu.memref_slice %arg1[%c4_i32_34, %c0_i32_35] : memref<32x128xf32, #tpu.memory_space<any>> -> memref<4x128xf32, #tpu.memory_space<any>>
    %38 = tpu.memref_slice %arg2[%c1_i32_31] : memref<8x!tpu.dma_semaphore, #tpu.memory_space<semaphore_mem>> -> memref<1x!tpu.dma_semaphore, #tpu.memory_space<semaphore_mem>>
    %39 = tpu.memref_squeeze %38 : memref<1x!tpu.dma_semaphore, #tpu.memory_space<semaphore_mem>> -> memref<!tpu.dma_semaphore, #tpu.memory_space<semaphore_mem>>
    tpu.wait_dma2 semaphore(%39 : memref<!tpu.dma_semaphore, #tpu.memory_space<semaphore_mem>>) src(%36 : memref<4x128xf32, #tpu.memory_space<any>>) dst(%37 : memref<4x128xf32, #tpu.memory_space<any>>)
    %c2_i32_36 = arith.constant 2 : i32
    %c8_i32_37 = arith.constant 8 : i32
    %c0_i32_38 = arith.constant 0 : i32
    %40 = tpu.memref_slice %arg0[%c8_i32_37, %c0_i32_38] : memref<32x128xf32, #tpu.memory_space<any>> -> memref<4x128xf32, #tpu.memory_space<any>>
    %c8_i32_39 = arith.constant 8 : i32
    %c0_i32_40 = arith.constant 0 : i32
    %41 = tpu.memref_slice %arg1[%c8_i32_39, %c0_i32_40] : memref<32x128xf32, #tpu.memory_space<any>> -> memref<4x128xf32, #tpu.memory_space<any>>
    %42 = tpu.memref_slice %arg2[%c2_i32_36] : memref<8x!tpu.dma_semaphore, #tpu.memory_space<semaphore_mem>> -> memref<1x!tpu.dma_semaphore, #tpu.memory_space<semaphore_mem>>
    %43 = tpu.memref_squeeze %42 : memref<1x!tpu.dma_semaphore, #tpu.memory_space<semaphore_mem>> -> memref<!tpu.dma_semaphore, #tpu.memory_space<semaphore_mem>>
    tpu.wait_dma2 semaphore(%43 : memref<!tpu.dma_semaphore, #tpu.memory_space<semaphore_mem>>) src(%40 : memref<4x128xf32, #tpu.memory_space<any>>) dst(%41 : memref<4x128xf32, #tpu.memory_space<any>>)
    %c3_i32_41 = arith.constant 3 : i32
    %c12_i32_42 = arith.constant 12 : i32
    %c0_i32_43 = arith.constant 0 : i32
    %44 = tpu.memref_slice %arg0[%c12_i32_42, %c0_i32_43] : memref<32x128xf32, #tpu.memory_space<any>> -> memref<4x128xf32, #tpu.memory_space<any>>
    %c12_i32_44 = arith.constant 12 : i32
    %c0_i32_45 = arith.constant 0 : i32
    %45 = tpu.memref_slice %arg1[%c12_i32_44, %c0_i32_45] : memref<32x128xf32, #tpu.memory_space<any>> -> memref<4x128xf32, #tpu.memory_space<any>>
    %46 = tpu.memref_slice %arg2[%c3_i32_41] : memref<8x!tpu.dma_semaphore, #tpu.memory_space<semaphore_mem>> -> memref<1x!tpu.dma_semaphore, #tpu.memory_space<semaphore_mem>>
    %47 = tpu.memref_squeeze %46 : memref<1x!tpu.dma_semaphore, #tpu.memory_space<semaphore_mem>> -> memref<!tpu.dma_semaphore, #tpu.memory_space<semaphore_mem>>
    tpu.wait_dma2 semaphore(%47 : memref<!tpu.dma_semaphore, #tpu.memory_space<semaphore_mem>>) src(%44 : memref<4x128xf32, #tpu.memory_space<any>>) dst(%45 : memref<4x128xf32, #tpu.memory_space<any>>)
    %c4_i32_46 = arith.constant 4 : i32
    %c16_i32_47 = arith.constant 16 : i32
    %c0_i32_48 = arith.constant 0 : i32
    %48 = tpu.memref_slice %arg0[%c16_i32_47, %c0_i32_48] : memref<32x128xf32, #tpu.memory_space<any>> -> memref<4x128xf32, #tpu.memory_space<any>>
    %c16_i32_49 = arith.constant 16 : i32
    %c0_i32_50 = arith.constant 0 : i32
    %49 = tpu.memref_slice %arg1[%c16_i32_49, %c0_i32_50] : memref<32x128xf32, #tpu.memory_space<any>> -> memref<4x128xf32, #tpu.memory_space<any>>
    %50 = tpu.memref_slice %arg2[%c4_i32_46] : memref<8x!tpu.dma_semaphore, #tpu.memory_space<semaphore_mem>> -> memref<1x!tpu.dma_semaphore, #tpu.memory_space<semaphore_mem>>
    %51 = tpu.memref_squeeze %50 : memref<1x!tpu.dma_semaphore, #tpu.memory_space<semaphore_mem>> -> memref<!tpu.dma_semaphore, #tpu.memory_space<semaphore_mem>>
    tpu.wait_dma2 semaphore(%51 : memref<!tpu.dma_semaphore, #tpu.memory_space<semaphore_mem>>) src(%48 : memref<4x128xf32, #tpu.memory_space<any>>) dst(%49 : memref<4x128xf32, #tpu.memory_space<any>>)
    %c5_i32_51 = arith.constant 5 : i32
    %c20_i32_52 = arith.constant 20 : i32
    %c0_i32_53 = arith.constant 0 : i32
    %52 = tpu.memref_slice %arg0[%c20_i32_52, %c0_i32_53] : memref<32x128xf32, #tpu.memory_space<any>> -> memref<4x128xf32, #tpu.memory_space<any>>
    %c20_i32_54 = arith.constant 20 : i32
    %c0_i32_55 = arith.constant 0 : i32
    %53 = tpu.memref_slice %arg1[%c20_i32_54, %c0_i32_55] : memref<32x128xf32, #tpu.memory_space<any>> -> memref<4x128xf32, #tpu.memory_space<any>>
    %54 = tpu.memref_slice %arg2[%c5_i32_51] : memref<8x!tpu.dma_semaphore, #tpu.memory_space<semaphore_mem>> -> memref<1x!tpu.dma_semaphore, #tpu.memory_space<semaphore_mem>>
    %55 = tpu.memref_squeeze %54 : memref<1x!tpu.dma_semaphore, #tpu.memory_space<semaphore_mem>> -> memref<!tpu.dma_semaphore, #tpu.memory_space<semaphore_mem>>
    tpu.wait_dma2 semaphore(%55 : memref<!tpu.dma_semaphore, #tpu.memory_space<semaphore_mem>>) src(%52 : memref<4x128xf32, #tpu.memory_space<any>>) dst(%53 : memref<4x128xf32, #tpu.memory_space<any>>)
    %c6_i32_56 = arith.constant 6 : i32
    %c24_i32_57 = arith.constant 24 : i32
    %c0_i32_58 = arith.constant 0 : i32
    %56 = tpu.memref_slice %arg0[%c24_i32_57, %c0_i32_58] : memref<32x128xf32, #tpu.memory_space<any>> -> memref<4x128xf32, #tpu.memory_space<any>>
    %c24_i32_59 = arith.constant 24 : i32
    %c0_i32_60 = arith.constant 0 : i32
    %57 = tpu.memref_slice %arg1[%c24_i32_59, %c0_i32_60] : memref<32x128xf32, #tpu.memory_space<any>> -> memref<4x128xf32, #tpu.memory_space<any>>
    %58 = tpu.memref_slice %arg2[%c6_i32_56] : memref<8x!tpu.dma_semaphore, #tpu.memory_space<semaphore_mem>> -> memref<1x!tpu.dma_semaphore, #tpu.memory_space<semaphore_mem>>
    %59 = tpu.memref_squeeze %58 : memref<1x!tpu.dma_semaphore, #tpu.memory_space<semaphore_mem>> -> memref<!tpu.dma_semaphore, #tpu.memory_space<semaphore_mem>>
    tpu.wait_dma2 semaphore(%59 : memref<!tpu.dma_semaphore, #tpu.memory_space<semaphore_mem>>) src(%56 : memref<4x128xf32, #tpu.memory_space<any>>) dst(%57 : memref<4x128xf32, #tpu.memory_space<any>>)
    %c7_i32_61 = arith.constant 7 : i32
    %c28_i32_62 = arith.constant 28 : i32
    %c0_i32_63 = arith.constant 0 : i32
    %60 = tpu.memref_slice %arg0[%c28_i32_62, %c0_i32_63] : memref<32x128xf32, #tpu.memory_space<any>> -> memref<4x128xf32, #tpu.memory_space<any>>
    %c28_i32_64 = arith.constant 28 : i32
    %c0_i32_65 = arith.constant 0 : i32
    %61 = tpu.memref_slice %arg1[%c28_i32_64, %c0_i32_65] : memref<32x128xf32, #tpu.memory_space<any>> -> memref<4x128xf32, #tpu.memory_space<any>>
    %62 = tpu.memref_slice %arg2[%c7_i32_61] : memref<8x!tpu.dma_semaphore, #tpu.memory_space<semaphore_mem>> -> memref<1x!tpu.dma_semaphore, #tpu.memory_space<semaphore_mem>>
    %63 = tpu.memref_squeeze %62 : memref<1x!tpu.dma_semaphore, #tpu.memory_space<semaphore_mem>> -> memref<!tpu.dma_semaphore, #tpu.memory_space<semaphore_mem>>
    tpu.wait_dma2 semaphore(%63 : memref<!tpu.dma_semaphore, #tpu.memory_space<semaphore_mem>>) src(%60 : memref<4x128xf32, #tpu.memory_space<any>>) dst(%61 : memref<4x128xf32, #tpu.memory_space<any>>)
    return
  }
}

</mosaic_0001>

<bundles_post_ra>
// kernel: tpu_custom_call.1
= control target key start
LH: loop header
LB: loop body
LE: loop exit
PB: predicated region body
PF: predicated region fallthrough
CT: control target
= control target key end

     0   :  { %s244_s9 = smov [#allocation2]   ;;  %s245_s10 = smov [#allocation3]   ;;  %s327_s0 = inlined_call_operand.hbm [shape: f32[32,128], index: 0, kind: input, shape index: {}]   ;;  %s328_s1 = inlined_call_operand.hbm [shape: f32[32,128], index: 1, kind: output, shape index: {}]  }
   0x1   :  { %s19_s8 = scalar_lea.hbm %s327_s0, 64  ;;  %s246_s11 = smov 0  }
   0x2   :  { %18 = dma.general %s327_s0, 64, %s328_s1, %s244_s9, %s245_s10, [#allocation4], %s246_s11, 0  }
   0x3   :  { %s20_s18 = scalar_lea.hbm %s328_s1, 64  ;;  %s35_s21 = scalar_lea.hbm %s327_s0, 128 }
   0x4   :  { %s247_s22 = smov [#allocation2 + $0x1]   ;;  %s248_s23 = smov [#allocation5]  }
   0x5   :  { %34 = dma.general %s19_s8, 64, %s20_s18, %s247_s22, %s248_s23, [#allocation6], %s246_s11, 0  }
   0x6   :  { %s36_s26 = scalar_lea.hbm %s328_s1, 128  ;;  %s51_s29 = scalar_lea.hbm %s327_s0, 192 }
   0x7   :  { %s249_s30 = smov [#allocation2 + $0x2]   ;;  %s250_s2 = smov [#allocation7]  }
   0x8   :  { %50 = dma.general %s35_s21, 64, %s36_s26, %s249_s30, %s250_s2, [#allocation8], %s246_s11, 0  }
   0x9   :  { %s52_s5 = scalar_lea.hbm %s328_s1, 192  ;;  %s67_s8 = scalar_lea.hbm %s327_s0, 256 }
   0xa   :  { %s251_s9 = smov [#allocation2 + $0x3]   ;;  %s252_s10 = smov [#allocation9]  }
   0xb   :  { %66 = dma.general %s51_s29, 64, %s52_s5, %s251_s9, %s252_s10, [#allocation10], %s246_s11, 0  }
   0xc   :  { %s68_s14 = scalar_lea.hbm %s328_s1, 256  ;;  %s83_s17 = scalar_lea.hbm %s327_s0, 320 }
   0xd   :  { %s253_s18 = smov [#allocation2 + $0x4]   ;;  %s254_s19 = smov [#allocation11]  }
   0xe   :  { %82 = dma.general %s67_s8, 64, %s68_s14, %s253_s18, %s254_s19, [#allocation12], %s246_s11, 0  }
   0xf   :  { %s84_s22 = scalar_lea.hbm %s328_s1, 320  ;;  %s99_s25 = scalar_lea.hbm %s327_s0, 384 }
  0x10   :  { %s255_s26 = smov [#allocation2 + $0x5]   ;;  %s256_s27 = smov [#allocation13]  }
  0x11   :  { %98 = dma.general %s83_s17, 64, %s84_s22, %s255_s26, %s256_s27, [#allocation14], %s246_s11, 0  }
  0x12   :  { %s100_s30 = scalar_lea.hbm %s328_s1, 384  ;;  %s115_s4 = scalar_lea.hbm %s327_s0, 448 }
  0x13   :  { %s257_s5 = smov [#allocation2 + $0x6]   ;;  %s258_s6 = smov [#allocation15]  }
  0x14   :  { %114 = dma.general %s99_s25, 64, %s100_s30, %s257_s5, %s258_s6, [#allocation16], %s246_s11, 0  }
  0x15   :  { %s116_s9 = scalar_lea.hbm %s328_s1, 448  ;;  %s259_s10 = smov [#allocation2 + $0x7]  }
  0x16   :  { %s260_s12 = smov [#allocation17]  }
  0x17   :  { %130 = dma.general %s115_s4, 64, %s116_s9, %s259_s10, %s260_s12, [#allocation18], %s246_s11, 0  }
  0x18   :  { %228 = dma.done.wait [#allocation2], 64 }
  0x19   :  { %229 = vsyncadd [#allocation2], 4294967232 }
  0x1a   :  { %230 = dma.done.wait [#allocation2 + $0x1], 64 }
  0x1b   :  { %231 = vsyncadd [#allocation2 + $0x1], 4294967232 }
  0x1c   :  { %232 = dma.done.wait [#allocation2 + $0x2], 64 }
  0x1d   :  { %233 = vsyncadd [#allocation2 + $0x2], 4294967232 }
  0x1e   :  { %234 = dma.done.wait [#allocation2 + $0x3], 64 }
  0x1f   :  { %235 = vsyncadd [#allocation2 + $0x3], 4294967232 }
  0x20   :  { %236 = dma.done.wait [#allocation2 + $0x4], 64 }
  0x21   :  { %237 = vsyncadd [#allocation2 + $0x4], 4294967232 }
  0x22   :  { %238 = dma.done.wait [#allocation2 + $0x5], 64 }
  0x23   :  { %239 = vsyncadd [#allocation2 + $0x5], 4294967232 }
  0x24   :  { %240 = dma.done.wait [#allocation2 + $0x6], 64 }
  0x25   :  { %241 = vsyncadd [#allocation2 + $0x6], 4294967232 }
  0x26   :  { %242 = dma.done.wait [#allocation2 + $0x7], 64 }
  0x27   :  { %243 = vsyncadd [#allocation2 + $0x7], 4294967232 }
  0x28   :  { %148 = vsyncmov [#allocation2] }
  0x2b   :  { %s149_s0 = vpop.sfrf %148 }
  0x2c   :  { %p203_p0 = scmp.ne.s32.totalorder %s149_s0, 0 }
  0x2e   :  { %153 = shalt.err (%p203_p0)  }
  0x2f   :  { %155 = vsyncmov [#allocation2 + $0x1] }
  0x32   :  { %s156_s1 = vpop.sfrf %155 }
  0x33   :  { %p204_p1 = scmp.ne.s32.totalorder %s156_s1, 0 }
  0x35   :  { %160 = shalt.err (%p204_p1)  }
  0x36   :  { %162 = vsyncmov [#allocation2 + $0x2] }
  0x39   :  { %s163_s11 = vpop.sfrf %162 }
  0x3a   :  { %p205_p2 = scmp.ne.s32.totalorder %s163_s11, 0 }
  0x3c   :  { %167 = shalt.err (%p205_p2)  }
  0x3d   :  { %169 = vsyncmov [#allocation2 + $0x3] }
  0x40   :  { %s170_s13 = vpop.sfrf %169 }
  0x41   :  { %p206_p3 = scmp.ne.s32.totalorder %s170_s13, 0 }
  0x43   :  { %174 = shalt.err (%p206_p3)  }
  0x44   :  { %176 = vsyncmov [#allocation2 + $0x4] }
  0x47   :  { %s177_s14 = vpop.sfrf %176 }
  0x48   :  { %p207_p4 = scmp.ne.s32.totalorder %s177_s14, 0 }
  0x4a   :  { %181 = shalt.err (%p207_p4)  }
  0x4b   :  { %183 = vsyncmov [#allocation2 + $0x5] }
  0x4e   :  { %s184_s15 = vpop.sfrf %183 }
  0x4f   :  { %p208_p5 = scmp.ne.s32.totalorder %s184_s15, 0 }
  0x51   :  { %188 = shalt.err (%p208_p5)  }
  0x52   :  { %190 = vsyncmov [#allocation2 + $0x6] }
  0x55   :  { %s191_s16 = vpop.sfrf %190 }
  0x56   :  { %p209_p6 = scmp.ne.s32.totalorder %s191_s16, 0 }
  0x58   :  { %195 = shalt.err (%p209_p6)  }
  0x59   :  { %197 = vsyncmov [#allocation2 + $0x7] }
  0x5c   :  { %s198_s17 = vpop.sfrf %197 }
  0x5d   :  { %p210_p7 = scmp.ne.s32.totalorder %s198_s17, 0 }
  0x5f   :  { %202 = shalt.err (%p210_p7)  }

</bundles_post_ra>
